<compile_context>
chip_gen: v5e
topology: v5e:2x2
jax: 0.10.0
libtpu: 0.0.40
codegen_flags: <defaults>
</compile_context>

<pallas_src>
import functools

import numpy as np
import jax
import jax.numpy as jnp
from jax.experimental import pallas as pl
from jax.experimental.pallas import tpu as pltpu


def qgen_kernel_full(a_ref, bt_ref, cz_ref, init_ref, out_ref):
    """General path (n_qubits > 7): two matmuls + one CZ-sign multiply / layer.

    a_ref:    (depth, P_R, P_R) f32  row-wire Kronecker RY factor per layer
    bt_ref:   (depth, 128, 128) f32  transposed lane-wire RY factor per layer
    cz_ref:   (P_R, 128) f32         CZ-chain diagonal sign mask
    init_ref: (P_R, 128) f32         post-Hadamard uniform state (zero-padded)
    out_ref:  (P_R, 128) f32         probabilities of all basis states
    """
    depth = bt_ref.shape[0]
    state = init_ref[...]
    cz = cz_ref[...]            # loaded once, reused across layers
    for i in range(depth):
        # Lane-wire RYs: contraction over the 128 lane states (canonical MXU op).
        state = jnp.dot(state, bt_ref[i],
                        preferred_element_type=jnp.float32,
                        precision=jax.lax.Precision.HIGHEST)
        # Row-wire RYs: small (P_R x P_R) contraction over the sublane states.
        state = jnp.dot(a_ref[i], state,
                        preferred_element_type=jnp.float32,
                        precision=jax.lax.Precision.HIGHEST)
        # CZ chain is diagonal: single elementwise sign multiply per layer.
        state = state * cz
    # Amplitudes stay real throughout -> probabilities are just the square.
    out_ref[...] = state * state


def qgen_kernel_lane(bt_ref, init_ref, out_ref):
    """Lane-only path (n_qubits <= 7): CZ diag already folded into B^T on the
    host, and the row-wire factor is the identity -> one matmul per layer.

    bt_ref:   (depth, 128, 128) f32  (RY kron) @ diag(CZ sign), transposed
    init_ref: (8, 128) f32           post-Hadamard uniform state (zero-padded)
    out_ref:  (8, 128) f32           probabilities of all basis states
    """
    depth = bt_ref.shape[0]
    state = init_ref[...]
    for i in range(depth):
        state = jnp.dot(state, bt_ref[i],
                        preferred_element_type=jnp.float32,
                        precision=jax.lax.Precision.HIGHEST)
    out_ref[...] = state * state


def _ry_kron(cos_v, sin_v):
    """Kronecker product of RY(theta) over the given wires (first wire = MSB)."""
    m = jnp.ones((1, 1), jnp.float32)
    for j in range(cos_v.shape[0]):
        c, s = cos_v[j], sin_v[j]
        # RY(t) = [[cos(t/2), -sin(t/2)], [sin(t/2), cos(t/2)]]
        ry = jnp.stack([jnp.stack([c, -s]), jnp.stack([s, c])])
        m = jnp.kron(m, ry)
    return m


def _cz_sign(n_qubits):
    """Flat (2**n_qubits,) CZ-chain diagonal sign (parameter independent)."""
    N = 1 << n_qubits
    idx = np.arange(N)
    sign = np.ones(N, np.float32)
    for y in range(n_qubits - 1):
        pa = n_qubits - 1 - y          # bit position of wire y   (LSB = 0)
        pb = n_qubits - 2 - y          # bit position of wire y+1
        both = ((idx >> pa) & 1) & ((idx >> pb) & 1)
        sign *= (1 - 2 * both).astype(np.float32)
    return sign


@functools.partial(
    jax.jit,
    static_argnames=("n_qubits", "depth", "a_qubits",
                     "partial_measure", "states_range"))
def quantum_generator_forward(q_params, n_qubits, depth, a_qubits,
                              partial_measure=False, states_range=(0,)):
    """Equivalent of QuantumGenerator.forward()."""
    N = 2 ** n_qubits
    n_lane_bits = min(n_qubits, 7)           # lane axis covers up to 7 wires
    n_row_bits = n_qubits - n_lane_bits      # remaining wires on the sublane axis
    r_log = 1 << n_row_bits
    c_log = 1 << n_lane_bits
    p_r = max(r_log, 8)                      # sublane-pad small row dims

    half = q_params.reshape(depth, n_qubits).astype(jnp.float32) * 0.5
    cos_t = jnp.cos(half)
    sin_t = jnp.sin(half)

    sign = _cz_sign(n_qubits)                # numpy, built at trace time

    # Per-layer fused RY factors (row wires -> A_i, lane wires -> B_i^T), built
    # in the glue so the kernel only sees ready-to-use, zero-padded MXU operands.
    a_layers, bt_layers = [], []
    for i in range(depth):
        b_i = _ry_kron(cos_t[i, n_row_bits:], sin_t[i, n_row_bits:])
        bt_i = b_i.T
        if n_row_bits == 0:
            # All wires live on lanes: fold the CZ diagonal into B^T so the
            # kernel layer is a single 128x128 matmul.
            bt_i = bt_i * jnp.asarray(sign)[None, :]
        bt_layers.append(bt_i)
        if n_row_bits > 0:
            a_layers.append(_ry_kron(cos_t[i, :n_row_bits], sin_t[i, :n_row_bits]))

    bt_mats = jnp.zeros((depth, 128, 128), jnp.float32)
    bt_mats = bt_mats.at[:, :c_log, :c_log].set(jnp.stack(bt_layers))

    init_np = np.zeros((p_r, 128), np.float32)
    init_np[:r_log, :c_log] = float(N) ** -0.5
    init = jnp.asarray(init_np)

    vmem_spec = pl.BlockSpec(memory_space=pltpu.MemorySpace.VMEM)

    if n_row_bits == 0:
        probs2d = pl.pallas_call(
            qgen_kernel_lane,
            out_shape=jax.ShapeDtypeStruct((p_r, 128), jnp.float32),
            in_specs=[vmem_spec, vmem_spec],
            out_specs=vmem_spec,
        )(bt_mats, init)
    else:
        a_mats = jnp.zeros((depth, p_r, p_r), jnp.float32)
        a_mats = a_mats.at[:, :r_log, :r_log].set(jnp.stack(a_layers))

        cz_np = np.zeros((p_r, 128), np.float32)
        cz_np[:r_log, :c_log] = sign.reshape(r_log, c_log)
        cz = jnp.asarray(cz_np)

        # Everything is VMEM-resident in a single grid-less call (~depth*64KB
        # of layer matrices plus a few (p_r,128) tiles).  Only raise the
        # scoped-VMEM limit when the simulator is scaled far past this size.
        vmem_bytes = 4 * int(a_mats.size + bt_mats.size + 4 * p_r * 128)
        compiler_params = None
        if vmem_bytes > 16 * 1024 * 1024:
            # TODO(synk): beyond ~23 qubits the single-tile state exceeds v7x's
            # 64 MiB physical VMEM and the row dim must be tiled over a grid.
            compiler_params = pltpu.CompilerParams(
                vmem_limit_bytes=min(int(vmem_bytes * 2), 100 * 1024 * 1024))

        probs2d = pl.pallas_call(
            qgen_kernel_full,
            out_shape=jax.ShapeDtypeStruct((p_r, 128), jnp.float32),
            in_specs=[vmem_spec, vmem_spec, vmem_spec, vmem_spec],
            out_specs=vmem_spec,
            compiler_params=compiler_params,
        )(a_mats, bt_mats, cz, init)

    # Strip the (8,128) padding and flatten: == ansatz(params).float().unsqueeze(0)
    probs = probs2d[:r_log, :c_log].reshape(1, N)

    if partial_measure:
        if len(states_range) == 1:
            s0, s1 = 0, 2 ** (n_qubits - a_qubits)
        else:
            s0, s1 = states_range
        p = probs[0, s0:s1]
        p = p / jnp.sum(p)
        return p.reshape(1, s1 - s0)
    return probs


def reference_forward(q_params, n_qubits, depth):
    """Pure-JAX statevector reference (gather-based), for correctness check."""
    N = 2 ** n_qubits
    half = q_params.reshape(depth, n_qubits).astype(jnp.float32) * 0.5
    cos_t = jnp.cos(half)
    sin_t = jnp.sin(half)
    state = jnp.full((N,), float(N) ** -0.5, dtype=jnp.float32)
    idx = jnp.arange(N)
    for i in range(depth):
        for y in range(n_qubits):
            pos = n_qubits - 1 - y
            d = 1 << pos
            partner = state[idx ^ d]
            b = (idx >> pos) & 1
            state = (cos_t[i, y] * state
                     + jnp.where(b == 0, -sin_t[i, y], sin_t[i, y]) * partner)
        sign = jnp.ones((N,), jnp.float32)
        for y in range(n_qubits - 1):
            pa = n_qubits - 1 - y
            pb = n_qubits - 2 - y
            both = (((idx >> pa) & 1) & ((idx >> pb) & 1)).astype(jnp.float32)
            sign = sign * (1.0 - 2.0 * both)
        state = state * sign
    return (state * state).reshape(1, N)


if __name__ == "__main__":
    key0, key1 = jax.random.split(jax.random.PRNGKey(0))

    # Representative config: 10 qubits (1024 states), 2 auxiliary qubits,
    # depth 3 -> q_params shape (30,) = nn.Parameter(torch.rand(depth * n_qubits)).
    n_qubits, a_qubits, depth = 10, 2, 3
    q_params = jax.random.uniform(key0, (depth * n_qubits,), dtype=jnp.float32)

    # forward() with partial_measure=False -> (1, 2**n_qubits)
    out = quantum_generator_forward(q_params, n_qubits, depth, a_qubits,
                                    partial_measure=False)
    out = jax.block_until_ready(out)
    ref = reference_forward(q_params, n_qubits, depth)
    assert out.shape == (1, 2 ** n_qubits)
    assert jnp.allclose(jnp.sum(out), 1.0, atol=1e-4)
    assert jnp.allclose(out, ref, atol=2e-5, rtol=2e-4)

    # forward() with partial_measure=True -> (1, 2**(n_qubits - a_qubits))
    out_pm = quantum_generator_forward(q_params, n_qubits, depth, a_qubits,
                                       partial_measure=True)
    out_pm = jax.block_until_ready(out_pm)
    n_keep = 2 ** (n_qubits - a_qubits)
    assert out_pm.shape == (1, n_keep)
    ref_pm = ref[0, :n_keep]
    ref_pm = (ref_pm / jnp.sum(ref_pm)).reshape(1, n_keep)
    assert jnp.allclose(out_pm, ref_pm, atol=2e-5, rtol=2e-4)

    # Small patch-GAN-style sub-generator (5 qubits, 1 auxiliary, depth 2):
    # exercises the lane-only fused path (CZ folded into B^T, one matmul/layer).
    n_q2, a_q2, d2 = 5, 1, 2
    q_params2 = jax.random.uniform(key1, (d2 * n_q2,), dtype=jnp.float32)
    out2 = quantum_generator_forward(q_params2, n_q2, d2, a_q2,
                                     partial_measure=True)
    out2 = jax.block_until_ready(out2)
    ref2 = reference_forward(q_params2, n_q2, d2)
    keep2 = 2 ** (n_q2 - a_q2)
    ref2_pm = ref2[0, :keep2]
    ref2_pm = (ref2_pm / jnp.sum(ref2_pm)).reshape(1, keep2)
    assert out2.shape == (1, keep2)
    assert jnp.allclose(out2, ref2_pm, atol=2e-5, rtol=2e-4)

    # Full-distribution output of the small generator (lane-only path, no slice).
    out2_full = quantum_generator_forward(q_params2, n_q2, d2, a_q2,
                                          partial_measure=False)
    out2_full = jax.block_until_ready(out2_full)
    assert out2_full.shape == (1, 2 ** n_q2)
    assert jnp.allclose(out2_full, ref2, atol=2e-5, rtol=2e-4)

    print("KERNEL_OK")
</pallas_src>

<mosaic_0001>
module attributes {stable_mosaic.version = 11 : i64} {
  func.func @qgen_kernel_full(%arg0: memref<3x8x8xf32, #tpu.memory_space<vmem>>, %arg1: memref<3x128x128xf32, #tpu.memory_space<vmem>>, %arg2: memref<8x128xf32, #tpu.memory_space<vmem>>, %arg3: memref<8x128xf32, #tpu.memory_space<vmem>>, %arg4: memref<8x128xf32, #tpu.memory_space<vmem>>) attributes {dimension_semantics = [], scalar_prefetch = 0 : i64, scratch_operands = 0 : i64, tpu.core_type = #tpu.core_type<tc>} {
    %c0 = arith.constant 0 : index
    %c0_0 = arith.constant 0 : index
    %0 = vector.load %arg3[%c0, %c0_0] : memref<8x128xf32, #tpu.memory_space<vmem>>, vector<8x128xf32>
    %c0_1 = arith.constant 0 : index
    %c0_2 = arith.constant 0 : index
    %1 = vector.load %arg2[%c0_1, %c0_2] : memref<8x128xf32, #tpu.memory_space<vmem>>, vector<8x128xf32>
    %c0_3 = arith.constant 0 : index
    %c0_4 = arith.constant 0 : index
    %c0_5 = arith.constant 0 : index
    %2 = vector.load %arg1[%c0_3, %c0_4, %c0_5] : memref<3x128x128xf32, #tpu.memory_space<vmem>>, vector<1x128x128xf32>
    %3 = vector.shape_cast %2 : vector<1x128x128xf32> to vector<128x128xf32>
    %cst = arith.constant dense<0.000000e+00> : vector<8x128xf32>
    %4 = tpu.matmul %0, %3, %cst {dimension_numbers = #tpu.dot_dimension_numbers<[1], [0], [0], [1], [0, 0, 1, 1], [], []>, precision = #tpu.contract_precision<fp32>} : vector<8x128xf32>, vector<128x128xf32>, vector<8x128xf32> -> vector<8x128xf32>
    %c0_6 = arith.constant 0 : index
    %c0_7 = arith.constant 0 : index
    %c0_8 = arith.constant 0 : index
    %5 = vector.load %arg0[%c0_6, %c0_7, %c0_8] : memref<3x8x8xf32, #tpu.memory_space<vmem>>, vector<1x8x8xf32>
    %6 = vector.shape_cast %5 : vector<1x8x8xf32> to vector<8x8xf32>
    %cst_9 = arith.constant dense<0.000000e+00> : vector<8x128xf32>
    %7 = tpu.matmul %6, %4, %cst_9 {dimension_numbers = #tpu.dot_dimension_numbers<[1], [0], [0], [1], [0, 0, 1, 1], [], []>, precision = #tpu.contract_precision<fp32>} : vector<8x8xf32>, vector<8x128xf32>, vector<8x128xf32> -> vector<8x128xf32>
    %8 = arith.mulf %7, %1 : vector<8x128xf32>
    %c1 = arith.constant 1 : index
    %c0_10 = arith.constant 0 : index
    %c0_11 = arith.constant 0 : index
    %9 = vector.load %arg1[%c1, %c0_10, %c0_11] : memref<3x128x128xf32, #tpu.memory_space<vmem>>, vector<1x128x128xf32>
    %10 = vector.shape_cast %9 : vector<1x128x128xf32> to vector<128x128xf32>
    %cst_12 = arith.constant dense<0.000000e+00> : vector<8x128xf32>
    %11 = tpu.matmul %8, %10, %cst_12 {dimension_numbers = #tpu.dot_dimension_numbers<[1], [0], [0], [1], [0, 0, 1, 1], [], []>, precision = #tpu.contract_precision<fp32>} : vector<8x128xf32>, vector<128x128xf32>, vector<8x128xf32> -> vector<8x128xf32>
    %c1_13 = arith.constant 1 : index
    %c0_14 = arith.constant 0 : index
    %c0_15 = arith.constant 0 : index
    %12 = vector.load %arg0[%c1_13, %c0_14, %c0_15] : memref<3x8x8xf32, #tpu.memory_space<vmem>>, vector<1x8x8xf32>
    %13 = vector.shape_cast %12 : vector<1x8x8xf32> to vector<8x8xf32>
    %cst_16 = arith.constant dense<0.000000e+00> : vector<8x128xf32>
    %14 = tpu.matmul %13, %11, %cst_16 {dimension_numbers = #tpu.dot_dimension_numbers<[1], [0], [0], [1], [0, 0, 1, 1], [], []>, precision = #tpu.contract_precision<fp32>} : vector<8x8xf32>, vector<8x128xf32>, vector<8x128xf32> -> vector<8x128xf32>
    %15 = arith.mulf %14, %1 : vector<8x128xf32>
    %c2 = arith.constant 2 : index
    %c0_17 = arith.constant 0 : index
    %c0_18 = arith.constant 0 : index
    %16 = vector.load %arg1[%c2, %c0_17, %c0_18] : memref<3x128x128xf32, #tpu.memory_space<vmem>>, vector<1x128x128xf32>
    %17 = vector.shape_cast %16 : vector<1x128x128xf32> to vector<128x128xf32>
    %cst_19 = arith.constant dense<0.000000e+00> : vector<8x128xf32>
    %18 = tpu.matmul %15, %17, %cst_19 {dimension_numbers = #tpu.dot_dimension_numbers<[1], [0], [0], [1], [0, 0, 1, 1], [], []>, precision = #tpu.contract_precision<fp32>} : vector<8x128xf32>, vector<128x128xf32>, vector<8x128xf32> -> vector<8x128xf32>
    %c2_20 = arith.constant 2 : index
    %c0_21 = arith.constant 0 : index
    %c0_22 = arith.constant 0 : index
    %19 = vector.load %arg0[%c2_20, %c0_21, %c0_22] : memref<3x8x8xf32, #tpu.memory_space<vmem>>, vector<1x8x8xf32>
    %20 = vector.shape_cast %19 : vector<1x8x8xf32> to vector<8x8xf32>
    %cst_23 = arith.constant dense<0.000000e+00> : vector<8x128xf32>
    %21 = tpu.matmul %20, %18, %cst_23 {dimension_numbers = #tpu.dot_dimension_numbers<[1], [0], [0], [1], [0, 0, 1, 1], [], []>, precision = #tpu.contract_precision<fp32>} : vector<8x8xf32>, vector<8x128xf32>, vector<8x128xf32> -> vector<8x128xf32>
    %22 = arith.mulf %21, %1 : vector<8x128xf32>
    %23 = arith.mulf %22, %22 : vector<8x128xf32>
    %c0_24 = arith.constant 0 : index
    %c0_25 = arith.constant 0 : index
    %24 = vector.load %arg4[%c0_24, %c0_25] : memref<8x128xf32, #tpu.memory_space<vmem>>, vector<8x128xf32>
    tpu.vector_store %arg4[%c0_24, %c0_25], %23 {strides = array<i32>} : memref<8x128xf32, #tpu.memory_space<vmem>>, vector<8x128xf32>,
    return
  }
}

</mosaic_0001>

<bundles_post_ra>
// kernel: quantum_generator_forward.1
= control target key start
LH: loop header
LB: loop body
LE: loop exit
PB: predicated region body
PF: predicated region fallthrough
CT: control target
= control target key end

     0   :  { %s2482_s0 = inlined_call_operand.vmem [shape: f32[3,8,8], index: 0, kind: input, shape index: {}]   ;;  %s2483_s1 = inlined_call_operand.vmem [shape: f32[3,128,128], index: 1, kind: input, shape index: {}]   ;;  %s2484_s2 = inlined_call_operand.vmem [shape: f32[8,128], index: 2, kind: input, shape index: {}]   ;;  %s2485_s3 = inlined_call_operand.vmem [shape: f32[8,128], index: 3, kind: input, shape index: {}]   ;;  %s2486_s4 = inlined_call_operand.hbm [shape: f32[8,128], index: 4, kind: output, shape index: {}]  }
   0x1   :  { %v35_v0 = vld [vmem:[%s2483_s1 + $0x78] sm:$0xff]  ;;  %v34_v1 = vld [vmem:[%s2483_s1 + $0x70] sm:$0xff]  ;;  %v33_v2 = vld [vmem:[%s2483_s1 + $0x68] sm:$0xff] }
   0x2   :  { %v1663_v3 = vand.u32 4294901760, %v35_v0  ;;  %v1665_v4 = vand.u32 4294901760, %v34_v1  ;;  %v1667_v5 = vand.u32 4294901760, %v33_v2  ;;  %v32_v6 = vld [vmem:[%s2483_s1 + $0x60] sm:$0xff]  ;;  %v31_v7 = vld [vmem:[%s2483_s1 + $0x58] sm:$0xff]  ;;  %v30_v8 = vld [vmem:[%s2483_s1 + $0x50] sm:$0xff] }
   0x3   :  { %v1678_v9 = vand.u32 4294901760, %v32_v6  ;;  %v1680_v10 = vand.u32 4294901760, %v31_v7  ;;  %v1682_v11 = vand.u32 4294901760, %v30_v8  ;;  %v29_v12 = vld [vmem:[%s2483_s1 + $0x48] sm:$0xff]  ;;  %v28_v13 = vld [vmem:[%s2483_s1 + $0x40] sm:$0xff]  ;;  %v27_v18 = vld [vmem:[%s2483_s1 + $0x38] sm:$0xff] }
   0x4   :  { %37 = vmatpush.msra.mxu0 %v1663_v3  ;;  %v1692_v14 = vsub.f32 %v35_v0, %v1663_v3  ;;  %v1695_v15 = vsub.f32 %v34_v1, %v1665_v4  ;;  %v1698_v16 = vsub.f32 %v33_v2, %v1667_v5  ;;  %v1700_v17 = vand.u32 4294901760, %v29_v12  ;;  %233 = vmatpush.msra.mxu3 %v1663_v3  ;;  %v26_v26 = vld [vmem:[%s2483_s1 + $0x30] sm:$0xff] }
   0x5   :  { %v1707_v19 = vsub.f32 %v32_v6, %v1678_v9  ;;  %v1710_v20 = vsub.f32 %v31_v7, %v1680_v10  ;;  %v1713_v21 = vsub.f32 %v30_v8, %v1682_v11  ;;  %v1719_v25 = vand.u32 4294901760, %v28_v13 }
   0x6   :  { %39 = vmatpush.msra.mxu0 %v1665_v4  ;;  %v79_v22 = vand.u32 4294901760, %v1692_v14  ;;  %v85_v23 = vand.u32 4294901760, %v1695_v15  ;;  %v91_v24 = vand.u32 4294901760, %v1698_v16  ;;  %180 = vmatpush.msra.mxu2 %v1692_v14  ;;  %v1726_v28 = vand.u32 4294901760, %v27_v18 }
   0x7   :  { %v97_v27 = vand.u32 4294901760, %v1707_v19  ;;  %v1729_v29 = vsub.f32 %v29_v12, %v1700_v17  ;;  %235 = vmatpush.msra.mxu3 %v1665_v4 }
   0x8   :  { %9 = vsyncpa [#allocation3], 0  ;;  %41 = vmatpush.msra.mxu0 %v1667_v5  ;;  %v80_v30 = vsub.f32 %v1692_v14, %v79_v22  ;;  %v86_v31 = vsub.f32 %v1695_v15, %v85_v23  ;;  %v92_v32 = vsub.f32 %v1698_v16, %v91_v24  ;;  %v103_v33 = vand.u32 4294901760, %v1710_v20  ;;  %183 = vmatpush.msra.mxu2 %v1695_v15  ;;  %v25_v36 = vld [vmem:[%s2483_s1 + $0x28] sm:$0xff]  ;;  %v24_v42 = vld [vmem:[%s2483_s1 + $0x20] sm:$0xff]  ;;  %s1558_s14 = sshll.u32 %s2486_s4, 4  ;;  %s1559_s14 = int_to_ptr.hbm [resolvable:$true] %s1558_s14 }
   0x9   :  { %v109_v34 = vand.u32 4294901760, %v1713_v21  ;;  %v1745_v35 = vand.u32 4294901760, %v26_v26  ;;  %237 = vmatpush.msra.mxu3 %v1667_v5  ;;  %v98_v39 = vsub.f32 %v1707_v19, %v97_v27  ;;  %v1756_v40 = vsub.f32 %v28_v13, %v1719_v25  ;;  %v23_v47 = vld [vmem:[%s2483_s1 + $0x18] sm:$0xff]  ;;  %v22_v55 = vld [vmem:[%s2483_s1 + $0x10] sm:$0xff]  ;;  %v21_v60 = vld [vmem:[%s2483_s1 + $0x8] sm:$0xff] }
   0xa   :  { %v81_v37 = vand.u32 4294901760, %v80_v30  ;;  %43 = vmatpush.msra.mxu0 %v1678_v9  ;;  %v87_v38 = vand.u32 4294901760, %v86_v31  ;;  %186 = vmatpush.msra.mxu2 %v1698_v16  ;;  %v115_v41 = vand.u32 4294901760, %v1729_v29  ;;  %v93_v43 = vand.u32 4294901760, %v92_v32  ;;  %v20_v1 = vld [vmem:[%s2483_s1] sm:$0xff] }
   0xb   :  { %239 = vmatpush.msra.mxu3 %v1678_v9  ;;  %v104_v44 = vsub.f32 %v1710_v20, %v103_v33  ;;  %v1768_v45 = vand.u32 4294901760, %v25_v36  ;;  %v1771_v46 = vsub.f32 %v27_v18, %v1726_v28  ;;  %v110_v48 = vsub.f32 %v1713_v21, %v109_v34  ;;  %v18_v7 = vld [vmem:[%s2485_s3] sm:$0xff] }
   0xc   :  { %82 = vmatpush.msra.mxu1 %v81_v37  ;;  %45 = vmatpush.msra.mxu0 %v1680_v10  ;;  %v99_v49 = vand.u32 4294901760, %v98_v39  ;;  %v121_v50 = vand.u32 4294901760, %v1756_v40  ;;  %v1783_v51 = vand.u32 4294901760, %v24_v42  ;;  %v1786_v52 = vsub.f32 %v26_v26, %v1745_v35 }
   0xd   :  { %189 = vmatpush.msra.mxu2 %v1707_v19  ;;  %241 = vmatpush.msra.mxu3 %v1680_v10  ;;  %v116_v53 = vsub.f32 %v1729_v29, %v115_v41  ;;  %v1791_v54 = vand.u32 4294901760, %v23_v47  ;;  %v105_v56 = vand.u32 4294901760, %v104_v44  ;;  %v127_v57 = vand.u32 4294901760, %v1771_v46 }
   0xe   :  { %88 = vmatpush.msra.mxu1 %v87_v38  ;;  %47 = vmatpush.msra.mxu0 %v1682_v11  ;;  %v1801_v58 = vsub.f32 %v25_v36, %v1768_v45  ;;  %v111_v59 = vand.u32 4294901760, %v110_v48  ;;  %v122_v61 = vsub.f32 %v1756_v40, %v121_v50  ;;  %v133_v62 = vand.u32 4294901760, %v1786_v52 }
   0xf   :  { %192 = vmatpush.msra.mxu2 %v1710_v20  ;;  %243 = vmatpush.msra.mxu3 %v1682_v11  ;;  %v1813_v63 = vand.u32 4294901760, %v22_v55  ;;  %v1816_v0 = vsub.f32 %v24_v42, %v1783_v51  ;;  %v117_v2 = vand.u32 4294901760, %v116_v53  ;;  %v1822_v6 = vsub.f32 %v23_v47, %v1791_v54 }
  0x10   :  { %94 = vmatpush.msra.mxu1 %v93_v43  ;;  %49 = vmatpush.msra.mxu0 %v1700_v17  ;;  %v128_v8 = vsub.f32 %v1771_v46, %v127_v57  ;;  %v139_v12 = vand.u32 4294901760, %v1801_v58  ;;  %v1834_v13 = vand.u32 4294901760, %v21_v60  ;;  %v1836_v18 = vand.u32 4294901760, %v18_v7 }
  0x11   :  { %195 = vmatpush.msra.mxu2 %v1713_v21  ;;  %245 = vmatpush.msra.mxu3 %v1700_v17  ;;  %v1838_v26 = vand.u32 4294901760, %v20_v1  ;;  %v123_v30 = vand.u32 4294901760, %v122_v61  ;;  %v134_v31 = vsub.f32 %v1786_v52, %v133_v62  ;;  %v145_v32 = vand.u32 4294901760, %v1816_v0 }
  0x12   :  { %100 = vmatpush.msra.mxu1 %v99_v49  ;;  %51 = vmatpush.msra.mxu0 %v1719_v25  ;;  %v1848_v36 = vsub.f32 %v22_v55, %v1813_v63  ;;  %v151_v37 = vand.u32 4294901760, %v1822_v6  ;;  %v129_v38 = vand.u32 4294901760, %v128_v8  ;;  %v140_v39 = vsub.f32 %v1801_v58, %v139_v12 }
  0x13   :  { %198 = vmatpush.msra.mxu2 %v1729_v29  ;;  %247 = vmatpush.msra.mxu3 %v1719_v25  ;;  %v1858_v42 = vsub.f32 %v21_v60, %v1834_v13  ;;  %v69_v43 = vsub.f32 %v18_v7, %v1836_v18  ;;  %v135_v44 = vand.u32 4294901760, %v134_v31  ;;  %v146_v47 = vsub.f32 %v1816_v0, %v145_v32 }
  0x14   :  { %106 = vmatpush.msra.mxu1 %v105_v56  ;;  %53 = vmatpush.msra.mxu0 %v1726_v28  ;;  %v157_v48 = vand.u32 4294901760, %v1848_v36  ;;  %v1869_v49 = vsub.f32 %v20_v1, %v1838_v26  ;;  %v141_v53 = vand.u32 4294901760, %v140_v39  ;;  %v152_v55 = vsub.f32 %v1822_v6, %v151_v37 }
  0x15   :  { %201 = vmatpush.msra.mxu2 %v1756_v40  ;;  %249 = vmatpush.msra.mxu3 %v1726_v28  ;;  %v163_v56 = vand.u32 4294901760, %v1858_v42  ;;  %v147_v60 = vand.u32 4294901760, %v146_v47  ;;  %vm378_vm0 = vcmask 64512   ;;  %v1579_v40 = vld [vmem:[%s2483_s1 + $0xe0] sm:$0xff] }
  0x16   :  { %112 = vmatpush.msra.mxu1 %v111_v59  ;;  %55 = vmatpush.msra.mxu0 %v1745_v35  ;;  %v70_v59 = vand.u32 4294901760, %v69_v43  ;;  %v158_v61 = vsub.f32 %v1848_v36, %v157_v48  ;;  %v169_v1 = vand.u32 4294901760, %v1869_v49 }
  0x17   :  { %204 = vmatpush.msra.mxu2 %v1771_v46  ;;  %251 = vmatpush.msra.mxu3 %v1745_v35  ;;  %v164_v7 = vsub.f32 %v1858_v42, %v163_v56 }
  0x18   :  { %118 = vmatpush.msra.mxu1 %v117_v2  ;;  %57 = vmatpush.msra.mxu0 %v1768_v45  ;;  %v153_v2 = vand.u32 4294901760, %v152_v55  ;;  %v71_v8 = vsub.f32 %v69_v43, %v70_v59  ;;  %v170_v31 = vsub.f32 %v1869_v49, %v169_v1 }
  0x19   :  { %207 = vmatpush.msra.mxu2 %v1786_v52  ;;  %253 = vmatpush.msra.mxu3 %v1768_v45  ;;  %v1986_v52 = vand.u32 4294901760, %v1579_v40 }
  0x1a   :  { %124 = vmatpush.msra.mxu1 %v123_v30  ;;  %59 = vmatpush.msra.mxu0 %v1783_v51  ;;  %v159_v30 = vand.u32 4294901760, %v158_v61  ;;  %v72_v39 = vand.u32 4294901760, %v71_v8 }
  0x1b   :  { %210 = vmatpush.msra.mxu2 %v1801_v58  ;;  %255 = vmatpush.msra.mxu3 %v1783_v51 }
  0x1c   :  { %130 = vmatpush.msra.mxu1 %v129_v38  ;;  %61 = vmatpush.msra.mxu0 %v1791_v54  ;;  %v165_v38 = vand.u32 4294901760, %v164_v7 }
  0x1d   :  { %213 = vmatpush.msra.mxu2 %v1816_v0  ;;  %257 = vmatpush.msra.mxu3 %v1791_v54  ;;  %v1999_v0 = vsub.f32 %v1579_v40, %v1986_v52 }
  0x1e   :  { %136 = vmatpush.msra.mxu1 %v135_v44  ;;  %63 = vmatpush.msra.mxu0 %v1813_v63  ;;  %v171_v44 = vand.u32 4294901760, %v170_v31 }
  0x1f   :  { %216 = vmatpush.msra.mxu2 %v1822_v6  ;;  %259 = vmatpush.msra.mxu3 %v1813_v63 }
  0x20   :  { %142 = vmatpush.msra.mxu1 %v141_v53  ;;  %65 = vmatpush.msra.mxu0 %v1834_v13  ;;  %v1574_v53 = vld [vmem:[%s2483_s1 + $0xb8] sm:$0xff] }
  0x21   :  { %219 = vmatpush.msra.mxu2 %v1848_v36  ;;  %261 = vmatpush.msra.mxu3 %v1834_v13  ;;  %v1575_v36 = vld [vmem:[%s2483_s1 + $0xc0] sm:$0xff] }
  0x22   :  { %148 = vmatpush.msra.mxu1 %v147_v60  ;;  %67 = vmatpush.msra.mxu0 %v1838_v26  ;;  %v2027_v47 = vand.u32 4294901760, %v1575_v36  ;;  %v1573_v60 = vld [vmem:[%s2483_s1 + $0xb0] sm:$0xff] }
  0x23   :  { %222 = vmatpush.msra.mxu2 %v1858_v42  ;;  %263 = vmatpush.msra.mxu3 %v1838_v26  ;;  %v2065_v31 = vand.u32 4294901760, %v1573_v60 }
  0x24   :  { %274 = vmatpush.msrb.mxu0 %v79_v22  ;;  %154 = vmatpush.msra.mxu1 %v153_v2  ;;  %v2051_v61 = vsub.f32 %v1575_v36, %v2027_v47 }
  0x25   :  { %225 = vmatpush.msra.mxu2 %v1869_v49  ;;  %267 = vmatmul.f32.vlgmr.msra.gmra.mxu3 %v70_v59  ;;  %v607_v59 = vand.u32 4294901760, %v1999_v0 }
  0x26   :  { %278 = vmatpush.msrb.mxu0 %v85_v23  ;;  %160 = vmatpush.msra.mxu1 %v159_v30  ;;  %v1582_v23 = vld [vmem:[%s2483_s1 + $0xf8] sm:$0xff]  ;;  %v1572_v30 = vld [vmem:[%s2483_s1 + $0xa8] sm:$0xff] }
  0x27   :  { %228 = vmatmul.f32.vlgmr.msra.gmra.mxu2 %v69_v43  ;;  %73 = vmatmul.f32.vlgmr.msra.gmra.mxu0 %v72_v39  ;;  %v608_v39 = vsub.f32 %v1999_v0, %v607_v59 }
  0x28   :  { %282 = vmatpush.msrb.mxu0 %v91_v24  ;;  %166 = vmatpush.msra.mxu1 %v165_v38  ;;  %v1581_v24 = vld [vmem:[%s2483_s1 + $0xf0] sm:$0xff] }
  0x2a   :  { %286 = vmatpush.msrb.mxu0 %v97_v27  ;;  %172 = vmatpush.msra.mxu1 %v171_v44  ;;  %v1962_v27 = vand.u32 4294901760, %v1582_v23 }
  0x2b   :  { %174 = vmatmul.f32.vlgmr.msra.gmra.mxu1 %v1836_v18 }
  0x2c   :  { %341 = vmatpush.msrb.mxu1 %v1663_v3  ;;  %290 = vmatpush.msrb.mxu0 %v103_v33  ;;  %v377_v3 = vld [vmem:[%s2482_s0] sm:$0xff]  ;;  %v1967_v33 = vand.u32 4294901760, %v1581_v24 }
  0x2e   :  { %343 = vmatpush.msrb.mxu1 %v1665_v4  ;;  %294 = vmatpush.msrb.mxu0 %v109_v34  ;;  %v380_v4 = vsel %vm378_vm0, %v377_v3, 0  ;;  %v1571_v3 = vld [vmem:[%s2483_s1 + $0xa0] sm:$0xff] }
  0x30   :  { %345 = vmatpush.msrb.mxu1 %v1667_v5  ;;  %298 = vmatpush.msrb.mxu0 %v115_v41 }
  0x32   :  { %347 = vmatpush.msrb.mxu1 %v1678_v9  ;;  %302 = vmatpush.msrb.mxu0 %v121_v50  ;;  %v1578_v50 = vld [vmem:[%s2483_s1 + $0xd8] sm:$0xff] }
  0x33   :  { %v1991_v58 = vand.u32 4294901760, %v1578_v50 }
  0x34   :  { %349 = vmatpush.msrb.mxu1 %v1680_v10  ;;  %306 = vmatpush.msrb.mxu0 %v127_v57  ;;  %v1947_v10 = vand.u32 4294901760, %v380_v4 }
  0x36   :  { %351 = vmatpush.msrb.mxu1 %v1682_v11  ;;  %310 = vmatpush.msrb.mxu0 %v133_v62  ;;  %v1950_v15 = vsub.f32 %v380_v4, %v1947_v10 }
  0x38   :  { %353 = vmatpush.msrb.mxu1 %v1700_v17  ;;  %314 = vmatpush.msrb.mxu0 %v139_v12  ;;  %v401_v19 = vand.u32 4294901760, %v1950_v15  ;;  %v1576_v12 = vld [vmem:[%s2483_s1 + $0xc8] sm:$0xff] }
  0x3a   :  { %355 = vmatpush.msrb.mxu1 %v1719_v25  ;;  %318 = vmatpush.msrb.mxu0 %v145_v32  ;;  %v402_v22 = vsub.f32 %v1950_v15, %v401_v19 }
  0x3c   :  { %357 = vmatpush.msrb.mxu1 %v1726_v28  ;;  %322 = vmatpush.msrb.mxu0 %v151_v37  ;;  %v1580_v28 = vld [vmem:[%s2483_s1 + $0xe8] sm:$0xff]  ;;  %v403_v41 = vand.u32 4294901760, %v402_v22  ;;  %v2017_v37 = vand.u32 4294901760, %v1576_v12 }
  0x3e   :  { %359 = vmatpush.msrb.mxu1 %v1745_v35  ;;  %326 = vmatpush.msrb.mxu0 %v157_v48  ;;  %v1970_v35 = vsub.f32 %v1582_v23, %v1962_v27  ;;  %v2038_v55 = vsub.f32 %v1576_v12, %v2017_v37 }
  0x40   :  { %361 = vmatpush.msrb.mxu1 %v1768_v45  ;;  %330 = vmatpush.msrb.mxu0 %v163_v56  ;;  %v1976_v45 = vand.u32 4294901760, %v1580_v28  ;;  %v589_v32 = vand.u32 4294901760, %v1970_v35 }
  0x42   :  { %363 = vmatpush.msrb.mxu1 %v1783_v51  ;;  %334 = vmatpush.msrb.mxu0 %v169_v1  ;;  %v1984_v51 = vsub.f32 %v1581_v24, %v1967_v33  ;;  %v1989_v57 = vsub.f32 %v1580_v28, %v1976_v45  ;;  %v590_v48 = vsub.f32 %v1970_v35, %v589_v32  ;;  %v2053_v1 = vand.u32 4294901760, %v1574_v53 }
  0x43   :  { %336 = vmatmul.f32.vlgmr.msrb.gmra.mxu0 %v1836_v18 }
  0x44   :  { %365 = vmatpush.msrb.mxu1 %v1791_v54  ;;  %690 = vmatpush.msra.mxu0 %v1970_v35  ;;  %v595_v42 = vand.u32 4294901760, %v1984_v51  ;;  %v601_v49 = vand.u32 4294901760, %v1989_v57  ;;  %v591_v2 = vand.u32 4294901760, %v590_v48  ;;  %v2081_v4 = vsub.f32 %v1574_v53, %v2053_v1 }
  0x46   :  { %367 = vmatpush.msrb.mxu1 %v1813_v63  ;;  %693 = vmatpush.msra.mxu0 %v1984_v51  ;;  %v1577_v63 = vld [vmem:[%s2483_s1 + $0xd0] sm:$0xff]  ;;  %v596_v56 = vsub.f32 %v1984_v51, %v595_v42  ;;  %v602_v7 = vsub.f32 %v1989_v57, %v601_v49  ;;  %v637_v28 = vand.u32 4294901760, %v2081_v4 }
  0x48   :  { %369 = vmatpush.msrb.mxu1 %v1834_v13  ;;  %696 = vmatpush.msra.mxu0 %v1989_v57  ;;  %v2007_v13 = vsub.f32 %v1578_v50, %v1991_v58  ;;  %v597_v38 = vand.u32 4294901760, %v596_v56 }
  0x4a   :  { %371 = vmatpush.msrb.mxu1 %v1838_v26  ;;  %699 = vmatpush.msra.mxu0 %v1999_v0  ;;  %v613_v8 = vand.u32 4294901760, %v2007_v13 }
  0x4b   :  { %373 = vmatmul.f32.vlgmr.msrb.gmra.mxu1 %v1836_v18  ;;  %v2009_v18 = vand.u32 4294901760, %v1577_v63 }
  0x4c   :  { %743 = vmatpush.msra.mxu1 %v1962_v27  ;;  %702 = vmatpush.msra.mxu0 %v2007_v13 }
  0x4d   :  { %v2025_v43 = vsub.f32 %v1577_v63, %v2009_v18 }
  0x4e   :  { %745 = vmatpush.msra.mxu1 %v1967_v33 }
  0x4f   :  { %705 = vmatpush.msra.mxu0 %v2025_v43  ;;  %v619_v44 = vand.u32 4294901760, %v2025_v43 }
  0x50   :  { %747 = vmatpush.msra.mxu1 %v1976_v45 }
  0x51   :  { %708 = vmatpush.msra.mxu0 %v2038_v55 }
  0x52   :  { %749 = vmatpush.msra.mxu1 %v1986_v52 }
  0x53   :  { %711 = vmatpush.msra.mxu0 %v2051_v61 }
  0x54   :  { %751 = vmatpush.msra.mxu1 %v1991_v58 }
  0x55   :  { %714 = vmatpush.msra.mxu0 %v2081_v4 }
  0x56   :  { %753 = vmatpush.msra.mxu1 %v2009_v18 }
  0x58   :  { %755 = vmatpush.msra.mxu1 %v2017_v37 }
  0x5a   :  { %757 = vmatpush.msra.mxu1 %v2027_v47 }
  0x5c   :  { %759 = vmatpush.msra.mxu1 %v2053_v1 }
  0x5e   :  { %761 = vmatpush.msra.mxu1 %v2065_v31 }
  0xa4   :  { %v74_v9 = vpop.f32.mrf.mxu0 }
  0xa8   :  { %v175_v5 = vpop.f32.mrf.mxu1  ;;  %v268_v17 = vpop.f32.mrf.mxu3 }
  0xa9   :  { %v176_v11 = vadd.f32 %v175_v5, %v74_v9  ;;  %v2083_v5 = vand.u32 4294901760, %v1572_v30  ;;  %v603_v9 = vand.u32 4294901760, %v602_v7 }
  0xaa   :  { %v229_v14 = vpop.f32.mrf.mxu2 }
  0xab   :  { %v230_v16 = vadd.f32 %v229_v14, %v176_v11  ;;  %v614_v11 = vsub.f32 %v2007_v13, %v613_v8  ;;  %v625_v14 = vand.u32 4294901760, %v2038_v55  ;;  %v2106_v22 = vsub.f32 %v1572_v30, %v2083_v5  ;;  %763 = vmatpush.msra.mxu1 %v2083_v5  ;;  %v1569_v30 = vld [vmem:[%s2483_s1 + $0x90] sm:$0xff]  ;;  %v2208_v13 = vld [vmem:[%s2484_s2] sm:$0xff] }
  0xad   :  { %v269_v20 = vadd.f32 %v268_v17, %v230_v16  ;;  %v2094_v16 = vsub.f32 %v1573_v60, %v2065_v31  ;;  %v2096_v17 = vand.u32 4294901760, %v1571_v3  ;;  %v615_v24 = vand.u32 4294901760, %v614_v11  ;;  %v1567_v11 = vld [vmem:[%s2483_s1 + $0x80] sm:$0xff] }
  0xaf   :  { %717 = vmatpush.msra.mxu0 %v2094_v16  ;;  %765 = vmatpush.msra.mxu1 %v2096_v17 }
  0xb1   :  { %720 = vmatpush.msra.mxu0 %v2106_v22 }
  0xc0   :  { %v337_v21 = vpop.f32.mrf.mxu0 }
  0xc1   :  { %v338_v25 = vadd.f32 %v337_v21, %v269_v20  ;;  %v620_v20 = vsub.f32 %v2025_v43, %v619_v44  ;;  %v631_v21 = vand.u32 4294901760, %v2051_v61 }
  0xc3   :  { %v632_v40 = vsub.f32 %v2051_v61, %v631_v21 }
  0xc8   :  { %v374_v29 = vpop.f32.mrf.mxu1 }
  0xc9   :  { %v375_v34 = vadd.f32 %v374_v29, %v338_v25  ;;  %v626_v25 = vsub.f32 %v2038_v55, %v625_v14  ;;  %v2118_v29 = vsub.f32 %v1571_v3, %v2096_v17 }
  0xcb   :  { %v397_v46 = vand.u32 4294901760, %v375_v34  ;;  %723 = vmatpush.msra.mxu0 %v2118_v29  ;;  %v627_v50 = vand.u32 4294901760, %v626_v25 }
  0xcd   :  { %v424_v54 = vsub.f32 %v375_v34, %v397_v46  ;;  %398 = vmatpush.msrb.mxu2 %v397_v46  ;;  %v621_v34 = vand.u32 4294901760, %v620_v20  ;;  %v576_v20 = vand.u32 4294901760, %v1567_v11 }
  0xce   :  { %404 = vmatmul.f32.vlgmr.msrb.gmra.mxu2 %v403_v41  ;;  %v643_v41 = vand.u32 4294901760, %v2094_v16 }
  0xcf   :  { %v425_v62 = vand.u32 4294901760, %v424_v54  ;;  %451 = vmatpush.msra.mxu2 %v424_v54 }
  0xd0   :  { %v644_v63 = vsub.f32 %v2094_v16, %v643_v41 }
  0xd1   :  { %500 = vmatpush.msrb.mxu2 %v425_v62  ;;  %v426_v6 = vsub.f32 %v424_v54, %v425_v62  ;;  %v638_v54 = vsub.f32 %v2081_v4, %v637_v28  ;;  %v649_v62 = vand.u32 4294901760, %v2106_v22 }
  0xd2   :  { %v645_v48 = vand.u32 4294901760, %v644_v63 }
  0xd3   :  { %v427_v26 = vand.u32 4294901760, %v426_v6  ;;  %v655_v6 = vand.u32 4294901760, %v2118_v29  ;;  %v639_v12 = vand.u32 4294901760, %v638_v54 }
  0xd5   :  { %428 = vmatpush.msrb.mxu3 %v427_v26  ;;  %v650_v26 = vsub.f32 %v2106_v22, %v649_v62  ;;  %v656_v53 = vsub.f32 %v2118_v29, %v655_v6  ;;  %v1598_v29 = vld [vmem:[%s2483_s1 + $0x170] sm:$0xff] }
  0xd6   :  { %430 = vmatmul.f32.vlgmr.msrb.gmra.mxu3 %v1947_v10  ;;  %454 = vmatmul.f32.vlgmr.msra.gmra.mxu2 %v1950_v15  ;;  %v1570_v15 = vld [vmem:[%s2483_s1 + $0x98] sm:$0xff] }
  0xd7   :  { %474 = vmatpush.msra.mxu3 %v397_v46  ;;  %547 = vmatpush.msra.mxu2 %v1962_v27  ;;  %v2108_v23 = vand.u32 4294901760, %v1570_v15  ;;  %v651_v56 = vand.u32 4294901760, %v650_v26  ;;  %v2235_v26 = vand.u32 4294901760, %v1598_v29 }
  0xd9   :  { %522 = vmatpush.msrb.mxu3 %v397_v46  ;;  %549 = vmatpush.msra.mxu2 %v1967_v33  ;;  %v2129_v46 = vsub.f32 %v1570_v15, %v2108_v23 }
  0xda   :  { %767 = vmatpush.msra.mxu1 %v2108_v23 }
  0xdb   :  { %551 = vmatpush.msra.mxu2 %v1976_v45  ;;  %726 = vmatpush.msra.mxu0 %v2129_v46  ;;  %v661_v36 = vand.u32 4294901760, %v2129_v46 }
  0xdd   :  { %553 = vmatpush.msra.mxu2 %v1986_v52  ;;  %v662_v60 = vsub.f32 %v2129_v46, %v661_v36 }
  0xde   :  { %478 = vmatmul.f32.vlgmr.msra.gmra.mxu3 %v401_v19  ;;  %502 = vmatmul.f32.vlgmr.msrb.gmra.mxu2 %v1947_v10  ;;  %v609_v19 = vand.u32 4294901760, %v608_v39  ;;  %v1568_v39 = vld [vmem:[%s2483_s1 + $0x88] sm:$0xff] }
  0xdf   :  { %592 = vmatpush.msra.mxu3 %v591_v2  ;;  %555 = vmatpush.msra.mxu2 %v1991_v58  ;;  %v657_v2 = vand.u32 4294901760, %v656_v53  ;;  %v663_v7 = vand.u32 4294901760, %v662_v60  ;;  %v1596_v53 = vld [vmem:[%s2483_s1 + $0x160] sm:$0xff] }
  0xe1   :  { %598 = vmatpush.msra.mxu3 %v597_v38  ;;  %557 = vmatpush.msra.mxu2 %v2009_v18  ;;  %v572_v38 = vand.u32 4294901760, %v1569_v30 }
  0xe3   :  { %604 = vmatpush.msra.mxu3 %v603_v9  ;;  %559 = vmatpush.msra.mxu2 %v2017_v37  ;;  %v666_v3 = vsub.f32 %v1569_v30, %v572_v38  ;;  %v574_v9 = vand.u32 4294901760, %v1568_v39  ;;  %v2252_v30 = vsub.f32 %v1598_v29, %v2235_v26 }
  0xe4   :  { %769 = vmatpush.msra.mxu1 %v572_v38 }
  0xe5   :  { %610 = vmatpush.msra.mxu3 %v609_v19  ;;  %561 = vmatpush.msra.mxu2 %v2027_v47  ;;  %v667_v15 = vand.u32 4294901760, %v666_v3  ;;  %v672_v19 = vsub.f32 %v1568_v39, %v574_v9 }
  0xe6   :  { %524 = vmatmul.f32.vlgmr.msrb.gmra.mxu3 %v1947_v10  ;;  %v633_v10 = vand.u32 4294901760, %v632_v40  ;;  %729 = vmatpush.msra.mxu0 %v666_v3 }
  0xe7   :  { %616 = vmatpush.msra.mxu3 %v615_v24  ;;  %563 = vmatpush.msra.mxu2 %v2053_v1  ;;  %v668_v24 = vsub.f32 %v666_v3, %v667_v15  ;;  %v673_v25 = vand.u32 4294901760, %v672_v19 }
  0xe8   :  { %771 = vmatpush.msra.mxu1 %v574_v9  ;;  %732 = vmatpush.msra.mxu0 %v672_v19 }
  0xe9   :  { %622 = vmatpush.msra.mxu3 %v621_v34  ;;  %565 = vmatpush.msra.mxu2 %v2065_v31  ;;  %v678_v34 = vsub.f32 %v1567_v11, %v576_v20  ;;  %v669_v40 = vand.u32 4294901760, %v668_v24  ;;  %v1593_v24 = vld [vmem:[%s2483_s1 + $0x148] sm:$0xff] }
  0xea   :  { %773 = vmatpush.msra.mxu1 %v576_v20 }
  0xeb   :  { %628 = vmatpush.msra.mxu3 %v627_v50  ;;  %567 = vmatpush.msra.mxu2 %v2083_v5  ;;  %v674_v50 = vsub.f32 %v672_v19, %v673_v25  ;;  %v679_v54 = vand.u32 4294901760, %v678_v34 }
  0xec   :  { %735 = vmatpush.msra.mxu0 %v678_v34 }
  0xed   :  { %634 = vmatpush.msra.mxu3 %v633_v10  ;;  %569 = vmatpush.msra.mxu2 %v2096_v17  ;;  %v675_v10 = vand.u32 4294901760, %v674_v50  ;;  %v680_v63 = vsub.f32 %v678_v34, %v679_v54 }
  0xef   :  { %640 = vmatpush.msra.mxu3 %v639_v12  ;;  %571 = vmatpush.msra.mxu2 %v2108_v23  ;;  %v681_v12 = vand.u32 4294901760, %v680_v63  ;;  %v1105_v63 = vand.u32 4294901760, %v2252_v30 }
  0xf1   :  { %646 = vmatpush.msra.mxu3 %v645_v48  ;;  %573 = vmatpush.msra.mxu2 %v572_v38 }
  0xf3   :  { %652 = vmatpush.msra.mxu3 %v651_v56  ;;  %575 = vmatpush.msra.mxu2 %v574_v9 }
  0xf5   :  { %658 = vmatpush.msra.mxu3 %v657_v2  ;;  %577 = vmatpush.msra.mxu2 %v576_v20 }
  0xf7   :  { %664 = vmatpush.msra.mxu3 %v663_v7  ;;  %784 = vmatpush.msrb.mxu2 %v589_v32  ;;  %v1595_v7 = vld [vmem:[%s2483_s1 + $0x158] sm:$0xff] }
  0xf9   :  { %788 = vmatpush.msrb.mxu2 %v595_v42  ;;  %670 = vmatpush.msra.mxu3 %v669_v40 }
  0xfb   :  { %792 = vmatpush.msrb.mxu2 %v601_v49  ;;  %676 = vmatpush.msra.mxu3 %v675_v10  ;;  %v2285_v10 = vand.u32 4294901760, %v1593_v24 }
  0xfd   :  { %796 = vmatpush.msrb.mxu2 %v607_v59  ;;  %682 = vmatpush.msra.mxu3 %v681_v12  ;;  %v1583_v59 = vld [vmem:[%s2482_s0 + $0x8] sm:$0xff] }
  0xfe   :  { %v890_v61 = vsel %vm378_vm0, %v1583_v59, 0 }
  0xff   :  { %851 = vmatpush.msrb.mxu3 %v1962_v27  ;;  %800 = vmatpush.msrb.mxu2 %v613_v8 }
 0x101   :  { %853 = vmatpush.msrb.mxu3 %v1967_v33  ;;  %804 = vmatpush.msrb.mxu2 %v619_v44 }
 0x103   :  { %855 = vmatpush.msrb.mxu3 %v1976_v45  ;;  %808 = vmatpush.msrb.mxu2 %v625_v14 }
 0x105   :  { %857 = vmatpush.msrb.mxu3 %v1986_v52  ;;  %812 = vmatpush.msrb.mxu2 %v631_v21 }
 0x107   :  { %859 = vmatpush.msrb.mxu3 %v1991_v58  ;;  %816 = vmatpush.msrb.mxu2 %v637_v28  ;;  %v1599_v28 = vld [vmem:[%s2483_s1 + $0x178] sm:$0xff] }
 0x108   :  { %v2230_v46 = vand.u32 4294901760, %v1599_v28 }
 0x109   :  { %861 = vmatpush.msrb.mxu3 %v2009_v18  ;;  %820 = vmatpush.msrb.mxu2 %v643_v41 }
 0x10a   :  { %v2238_v48 = vsub.f32 %v1599_v28, %v2230_v46 }
 0x10b   :  { %863 = vmatpush.msrb.mxu3 %v2017_v37  ;;  %824 = vmatpush.msrb.mxu2 %v649_v62  ;;  %v1597_v62 = vld [vmem:[%s2483_s1 + $0x168] sm:$0xff] }
 0x10c   :  { %v2244_v60 = vand.u32 4294901760, %v1597_v62  ;;  %v1099_v50 = vand.u32 4294901760, %v2238_v48 }
 0x10d   :  { %865 = vmatpush.msrb.mxu3 %v2027_v47  ;;  %828 = vmatpush.msrb.mxu2 %v655_v6 }
 0x10e   :  { %v2257_v3 = vsub.f32 %v1597_v62, %v2244_v60 }
 0x10f   :  { %867 = vmatpush.msrb.mxu3 %v2053_v1  ;;  %832 = vmatpush.msrb.mxu2 %v661_v36  ;;  %v2215_v1 = vand.u32 4294901760, %v890_v61 }
 0x111   :  { %869 = vmatpush.msrb.mxu3 %v2065_v31  ;;  %836 = vmatpush.msrb.mxu2 %v667_v15  ;;  %v2218_v44 = vsub.f32 %v890_v61, %v2215_v1  ;;  %v1594_v15 = vld [vmem:[%s2483_s1 + $0x150] sm:$0xff]  ;;  %v1588_v61 = vld [vmem:[%s2483_s1 + $0x120] sm:$0xff] }
 0x112   :  { %v2277_v34 = vand.u32 4294901760, %v1594_v15 }
 0x113   :  { %871 = vmatpush.msrb.mxu3 %v2083_v5  ;;  %840 = vmatpush.msrb.mxu2 %v673_v25  ;;  %v911_v16 = vand.u32 4294901760, %v2218_v44 }
 0x114   :  { %v2293_v12 = vsub.f32 %v1594_v15, %v2277_v34 }
 0x115   :  { %873 = vmatpush.msrb.mxu3 %v2096_v17  ;;  %844 = vmatpush.msrb.mxu2 %v679_v54  ;;  %v1592_v54 = vld [vmem:[%s2483_s1 + $0x140] sm:$0xff] }
 0x116   :  { %v1129_v59 = vand.u32 4294901760, %v2293_v12 }
 0x117   :  { %875 = vmatpush.msrb.mxu3 %v2108_v23  ;;  %v912_v23 = vsub.f32 %v2218_v44, %v911_v16 }
 0x119   :  { %877 = vmatpush.msrb.mxu3 %v572_v38  ;;  %v913_v56 = vand.u32 4294901760, %v912_v23  ;;  %v2254_v38 = vand.u32 4294901760, %v1596_v53 }
 0x11b   :  { %879 = vmatpush.msrb.mxu3 %v574_v9  ;;  %v2259_v9 = vand.u32 4294901760, %v1595_v7  ;;  %v2267_v19 = vsub.f32 %v1596_v53, %v2254_v38 }
 0x11d   :  { %881 = vmatpush.msrb.mxu3 %v576_v20  ;;  %v2275_v25 = vsub.f32 %v1595_v7, %v2259_v9 }
 0x151   :  { %v405_v27 = vpop.f32.mrf.mxu2 }
 0x159   :  { %v431_v33 = vpop.f32.mrf.mxu3  ;;  %v455_v35 = vpop.f32.mrf.mxu2 }
 0x15a   :  { %v432_v45 = vadd.f32 %v431_v33, %v405_v27  ;;  %v2295_v27 = vand.u32 4294901760, %v1592_v54  ;;  %v1100_v33 = vsub.f32 %v2238_v48, %v1099_v50 }
 0x15c   :  { %v456_v52 = vadd.f32 %v455_v35, %v432_v45  ;;  %v1111_v35 = vand.u32 4294901760, %v2257_v3  ;;  %v1591_v45 = vld [vmem:[%s2483_s1 + $0x138] sm:$0xff] }
 0x161   :  { %v479_v51 = vpop.f32.mrf.mxu3  ;;  %v503_v58 = vpop.f32.mrf.mxu2 }
 0x162   :  { %v480_v57 = vadd.f32 %v479_v51, %v456_v52  ;;  %v2306_v51 = vsub.f32 %v1593_v24, %v2285_v10  ;;  %v1106_v52 = vsub.f32 %v2252_v30, %v1105_v63 }
 0x164   :  { %v504_v0 = vadd.f32 %v503_v58, %v480_v57  ;;  %v1117_v57 = vand.u32 4294901760, %v2267_v19  ;;  %v1590_v58 = vld [vmem:[%s2483_s1 + $0x130] sm:$0xff] }
 0x169   :  { %v525_v18 = vpop.f32.mrf.mxu3 }
 0x16a   :  { %v526_v32 = vadd.f32 %v525_v18, %v504_v0  ;;  %v2319_v0 = vsub.f32 %v1592_v54, %v2295_v27  ;;  %v2321_v18 = vand.u32 4294901760, %v1591_v45 }
 0x16c   :  { %v528_v37 = vmul.f32 %v526_v32, %v2208_v13  ;;  %v1101_v32 = vand.u32 4294901760, %v1100_v33  ;;  %v1141_v23 = vand.u32 4294901760, %v2319_v0 }
 0x16e   :  { %v578_v42 = vand.u32 4294901760, %v528_v37 }
 0x170   :  { %v579_v43 = vsub.f32 %v528_v37, %v578_v42  ;;  %684 = vmatmul.f32.vlgmr.msra.gmra.mxu3 %v578_v42  ;;  %v1112_v37 = vsub.f32 %v2257_v3, %v1111_v35 }
 0x171   :  { %1253 = vmatpush.msra.mxu3 %v2230_v46 }
 0x172   :  { %738 = vmatmul.f32.vlgmr.msra.gmra.mxu0 %v579_v43  ;;  %v580_v47 = vand.u32 4294901760, %v579_v43 }
 0x173   :  { %1255 = vmatpush.msra.mxu3 %v2235_v26 }
 0x174   :  { %777 = vmatmul.f32.vlgmr.msra.gmra.mxu1 %v580_v47  ;;  %v581_v49 = vsub.f32 %v579_v43, %v580_v47  ;;  %v1589_v43 = vld [vmem:[%s2483_s1 + $0x128] sm:$0xff]  ;;  %v2333_v47 = vand.u32 4294901760, %v1590_v58 }
 0x175   :  { %1257 = vmatpush.msra.mxu3 %v2244_v60 }
 0x176   :  { %v582_v55 = vand.u32 4294901760, %v581_v49  ;;  %v1107_v49 = vand.u32 4294901760, %v1106_v52 }
 0x177   :  { %1259 = vmatpush.msra.mxu3 %v2254_v38 }
 0x178   :  { %583 = vmatmul.f32.vlgmr.msra.gmra.mxu2 %v582_v55  ;;  %883 = vmatmul.f32.vlgmr.msrb.gmra.mxu3 %v578_v42  ;;  %v1118_v55 = vsub.f32 %v2267_v19, %v1117_v57 }
 0x179   :  { %1200 = vmatpush.msra.mxu2 %v2238_v48  ;;  %1261 = vmatpush.msra.mxu3 %v2259_v9 }
 0x17b   :  { %1203 = vmatpush.msra.mxu2 %v2252_v30  ;;  %1263 = vmatpush.msra.mxu3 %v2277_v34 }
 0x17d   :  { %1206 = vmatpush.msra.mxu2 %v2257_v3  ;;  %1265 = vmatpush.msra.mxu3 %v2285_v10 }
 0x17f   :  { %1209 = vmatpush.msra.mxu2 %v2267_v19  ;;  %1267 = vmatpush.msra.mxu3 %v2295_v27 }
 0x180   :  { %846 = vmatmul.f32.vlgmr.msrb.gmra.mxu2 %v578_v42  ;;  %v1123_v42 = vand.u32 4294901760, %v2275_v25 }
 0x181   :  { %1212 = vmatpush.msra.mxu2 %v2275_v25  ;;  %1269 = vmatpush.msra.mxu3 %v2321_v18 }
 0x183   :  { %1215 = vmatpush.msra.mxu2 %v2293_v12  ;;  %1271 = vmatpush.msra.mxu3 %v2333_v47 }
 0x185   :  { %1218 = vmatpush.msra.mxu2 %v2306_v51 }
 0x187   :  { %1221 = vmatpush.msra.mxu2 %v2319_v0 }
 0x1ef   :  { %v739_v5 = vpop.f32.mrf.mxu0 }
 0x1f1   :  { %v778_v17 = vpop.f32.mrf.mxu1 }
 0x1f3   :  { %v685_v8 = vpop.f32.mrf.mxu3 }
 0x1fb   :  { %v584_v31 = vpop.f32.mrf.mxu2  ;;  %v884_v6 = vpop.f32.mrf.mxu3 }
 0x1fc   :  { %v686_v4 = vadd.f32 %v685_v8, %v584_v31  ;;  %v2349_v8 = vsub.f32 %v1591_v45, %v2321_v18  ;;  %v2351_v31 = vand.u32 4294901760, %v1589_v43 }
 0x1fe   :  { %v740_v14 = vadd.f32 %v739_v5, %v686_v4  ;;  %v1113_v4 = vand.u32 4294901760, %v1112_v37  ;;  %v1124_v5 = vsub.f32 %v2275_v25, %v1123_v42  ;;  %1224 = vmatpush.msra.mxu2 %v2349_v8  ;;  %v2374_v28 = vsub.f32 %v1589_v43, %v2351_v31  ;;  %1273 = vmatpush.msra.mxu3 %v2351_v31 }
 0x200   :  { %v779_v21 = vadd.f32 %v778_v17, %v740_v14  ;;  %v1135_v14 = vand.u32 4294901760, %v2306_v51  ;;  %v2364_v17 = vand.u32 4294901760, %v1588_v61  ;;  %v1159_v15 = vand.u32 4294901760, %v2374_v28 }
 0x202   :  { %v1136_v62 = vsub.f32 %v2306_v51, %v1135_v14  ;;  %1275 = vmatpush.msra.mxu3 %v2364_v17  ;;  %v1160_v54 = vsub.f32 %v2374_v28, %v1159_v15  ;;  %v1600_v51 = vld [vmem:[%s2482_s0 + $0x10] sm:$0xff]  ;;  %s1628_s0 = smov [#allocation2]  }
 0x203   :  { %v847_v22 = vpop.f32.mrf.mxu2  ;;  %s1556_s11 = sshll.u32 %s1628_s0, 4  ;;  %s1557_s11 = int_to_ptr.vmem [resolvable:$true] %s1556_s11 }
 0x204   :  { %v848_v41 = vadd.f32 %v847_v22, %v779_v21  ;;  %v1119_v21 = vand.u32 4294901760, %v1118_v55  ;;  %v1130_v22 = vsub.f32 %v2293_v12, %v1129_v59 }
 0x206   :  { %v885_v36 = vadd.f32 %v884_v6, %v848_v41  ;;  %v1125_v41 = vand.u32 4294901760, %v1124_v5  ;;  %v1147_v6 = vand.u32 4294901760, %v2349_v8  ;;  %v1131_v53 = vand.u32 4294901760, %v1130_v22 }
 0x208   :  { %v907_v2 = vand.u32 4294901760, %v885_v36 }
 0x20a   :  { %v934_v39 = vsub.f32 %v885_v36, %v907_v2  ;;  %908 = vmatpush.msrb.mxu0 %v907_v2  ;;  %v2386_v36 = vsub.f32 %v1588_v61, %v2364_v17  ;;  %v1585_v61 = vld [vmem:[%s2483_s1 + $0x108] sm:$0xff] }
 0x20b   :  { %914 = vmatmul.f32.vlgmr.msrb.gmra.mxu0 %v913_v56  ;;  %v1142_v56 = vsub.f32 %v2319_v0, %v1141_v23  ;;  %v1084_v5 = vand.u32 4294901760, %v1585_v61 }
 0x20c   :  { %961 = vmatpush.msra.mxu0 %v934_v39  ;;  %v935_v11 = vand.u32 4294901760, %v934_v39  ;;  %v1165_v24 = vand.u32 4294901760, %v2386_v36 }
 0x20d   :  { %v1182_v22 = vsub.f32 %v1585_v61, %v1084_v5 }
 0x20e   :  { %1010 = vmatpush.msrb.mxu0 %v935_v11  ;;  %v936_v20 = vsub.f32 %v934_v39, %v935_v11  ;;  %v1137_v39 = vand.u32 4294901760, %v1136_v62  ;;  %v1148_v11 = vsub.f32 %v2349_v8, %v1147_v6  ;;  %v1166_v52 = vsub.f32 %v2386_v36, %v1165_v24 }
 0x210   :  { %v937_v40 = vand.u32 4294901760, %v936_v20  ;;  %v1167_v37 = vand.u32 4294901760, %v1166_v52 }
 0x212   :  { %938 = vmatpush.msrb.mxu1 %v937_v40  ;;  %v1149_v40 = vand.u32 4294901760, %v1148_v11 }
 0x213   :  { %940 = vmatmul.f32.vlgmr.msrb.gmra.mxu1 %v2215_v1  ;;  %964 = vmatmul.f32.vlgmr.msra.gmra.mxu0 %v2218_v44  ;;  %v1587_v44 = vld [vmem:[%s2483_s1 + $0x118] sm:$0xff] }
 0x214   :  { %984 = vmatpush.msra.mxu1 %v907_v2  ;;  %1057 = vmatpush.msra.mxu0 %v2230_v46  ;;  %v2376_v29 = vand.u32 4294901760, %v1587_v44 }
 0x216   :  { %1032 = vmatpush.msrb.mxu1 %v907_v2  ;;  %1059 = vmatpush.msra.mxu0 %v2235_v26  ;;  %v2397_v7 = vsub.f32 %v1587_v44, %v2376_v29  ;;  %v1584_v44 = vld [vmem:[%s2483_s1 + $0x100] sm:$0xff] }
 0x217   :  { %1277 = vmatpush.msra.mxu3 %v2376_v29 }
 0x218   :  { %1061 = vmatpush.msra.mxu0 %v2244_v60  ;;  %v1171_v33 = vand.u32 4294901760, %v2397_v7 }
 0x21a   :  { %1063 = vmatpush.msra.mxu0 %v2254_v38 }
 0x21b   :  { %988 = vmatmul.f32.vlgmr.msra.gmra.mxu1 %v911_v16  ;;  %1012 = vmatmul.f32.vlgmr.msrb.gmra.mxu0 %v2215_v1  ;;  %v2362_v16 = vsub.f32 %v1590_v58, %v2333_v47  ;;  %v1161_v58 = vand.u32 4294901760, %v1160_v54 }
 0x21c   :  { %1102 = vmatpush.msra.mxu1 %v1101_v32  ;;  %1065 = vmatpush.msra.mxu0 %v2259_v9  ;;  %v1172_v32 = vsub.f32 %v2397_v7, %v1171_v33 }
 0x21d   :  { %1227 = vmatpush.msra.mxu2 %v2362_v16  ;;  %v1153_v2 = vand.u32 4294901760, %v2362_v16 }
 0x21e   :  { %1108 = vmatpush.msra.mxu1 %v1107_v49  ;;  %1067 = vmatpush.msra.mxu0 %v2277_v34  ;;  %v1173_v43 = vand.u32 4294901760, %v1172_v32  ;;  %v1586_v49 = vld [vmem:[%s2483_s1 + $0x110] sm:$0xff] }
 0x21f   :  { %1230 = vmatpush.msra.mxu2 %v2374_v28  ;;  %v1154_v20 = vsub.f32 %v2362_v16, %v1153_v2  ;;  %v1082_v55 = vand.u32 4294901760, %v1586_v49 }
 0x220   :  { %1114 = vmatpush.msra.mxu1 %v1113_v4  ;;  %1069 = vmatpush.msra.mxu0 %v2285_v10 }
 0x221   :  { %1233 = vmatpush.msra.mxu2 %v2386_v36  ;;  %v1155_v45 = vand.u32 4294901760, %v1154_v20  ;;  %v1176_v4 = vsub.f32 %v1586_v49, %v1082_v55  ;;  %1279 = vmatpush.msra.mxu3 %v1082_v55 }
 0x222   :  { %1120 = vmatpush.msra.mxu1 %v1119_v21  ;;  %1071 = vmatpush.msra.mxu0 %v2295_v27 }
 0x223   :  { %1034 = vmatmul.f32.vlgmr.msrb.gmra.mxu1 %v2215_v1  ;;  %1236 = vmatpush.msra.mxu2 %v2397_v7  ;;  %v1143_v1 = vand.u32 4294901760, %v1142_v56  ;;  %v1177_v21 = vand.u32 4294901760, %v1176_v4 }
 0x224   :  { %1126 = vmatpush.msra.mxu1 %v1125_v41  ;;  %1073 = vmatpush.msra.mxu0 %v2321_v18  ;;  %v1086_v41 = vand.u32 4294901760, %v1584_v44 }
 0x225   :  { %1239 = vmatpush.msra.mxu2 %v1176_v4  ;;  %1281 = vmatpush.msra.mxu3 %v1084_v5  ;;  %v1178_v62 = vsub.f32 %v1176_v4, %v1177_v21 }
 0x226   :  { %1132 = vmatpush.msra.mxu1 %v1131_v53  ;;  %1075 = vmatpush.msra.mxu0 %v2333_v47  ;;  %v1183_v53 = vand.u32 4294901760, %v1182_v22  ;;  %v1188_v56 = vsub.f32 %v1584_v44, %v1086_v41 }
 0x227   :  { %1242 = vmatpush.msra.mxu2 %v1182_v22  ;;  %1283 = vmatpush.msra.mxu3 %v1086_v41 }
 0x228   :  { %1138 = vmatpush.msra.mxu1 %v1137_v39  ;;  %1077 = vmatpush.msra.mxu0 %v2351_v31  ;;  %v1179_v39 = vand.u32 4294901760, %v1178_v62  ;;  %v1184_v11 = vsub.f32 %v1182_v22, %v1183_v53 }
 0x229   :  { %1245 = vmatpush.msra.mxu2 %v1188_v56 }
 0x22a   :  { %1144 = vmatpush.msra.mxu1 %v1143_v1  ;;  %1079 = vmatpush.msra.mxu0 %v2364_v17  ;;  %v1189_v1 = vand.u32 4294901760, %v1188_v56  ;;  %v1185_v20 = vand.u32 4294901760, %v1184_v11 }
 0x22c   :  { %1150 = vmatpush.msra.mxu1 %v1149_v40  ;;  %1081 = vmatpush.msra.mxu0 %v2376_v29  ;;  %v1190_v40 = vsub.f32 %v1188_v56, %v1189_v1 }
 0x22e   :  { %1156 = vmatpush.msra.mxu1 %v1155_v45  ;;  %1083 = vmatpush.msra.mxu0 %v1082_v55  ;;  %v1191_v54 = vand.u32 4294901760, %v1190_v40 }
 0x230   :  { %1162 = vmatpush.msra.mxu1 %v1161_v58  ;;  %1085 = vmatpush.msra.mxu0 %v1084_v5 }
 0x232   :  { %1168 = vmatpush.msra.mxu1 %v1167_v37  ;;  %1087 = vmatpush.msra.mxu0 %v1086_v41 }
 0x234   :  { %1174 = vmatpush.msra.mxu1 %v1173_v43  ;;  %1294 = vmatpush.msrb.mxu0 %v1099_v50 }
 0x236   :  { %1298 = vmatpush.msrb.mxu0 %v1105_v63  ;;  %1180 = vmatpush.msra.mxu1 %v1179_v39 }
 0x238   :  { %1302 = vmatpush.msrb.mxu0 %v1111_v35  ;;  %1186 = vmatpush.msra.mxu1 %v1185_v20 }
 0x23a   :  { %1306 = vmatpush.msrb.mxu0 %v1117_v57  ;;  %1192 = vmatpush.msra.mxu1 %v1191_v54  ;;  %v1400_v57 = vsel %vm378_vm0, %v1600_v51, 0 }
 0x23b   :  { %v1419_v0 = vand.u32 4294901760, %v1400_v57 }
 0x23c   :  { %1361 = vmatpush.msrb.mxu1 %v2230_v46  ;;  %1310 = vmatpush.msrb.mxu0 %v1123_v42 }
 0x23e   :  { %1363 = vmatpush.msrb.mxu1 %v2235_v26  ;;  %1314 = vmatpush.msrb.mxu0 %v1129_v59 }
 0x240   :  { %1365 = vmatpush.msrb.mxu1 %v2244_v60  ;;  %1318 = vmatpush.msrb.mxu0 %v1135_v14 }
 0x242   :  { %1367 = vmatpush.msrb.mxu1 %v2254_v38  ;;  %1322 = vmatpush.msrb.mxu0 %v1141_v23 }
 0x244   :  { %1369 = vmatpush.msrb.mxu1 %v2259_v9  ;;  %1326 = vmatpush.msrb.mxu0 %v1147_v6 }
 0x246   :  { %1371 = vmatpush.msrb.mxu1 %v2277_v34  ;;  %1330 = vmatpush.msrb.mxu0 %v1153_v2 }
 0x248   :  { %1373 = vmatpush.msrb.mxu1 %v2285_v10  ;;  %1334 = vmatpush.msrb.mxu0 %v1159_v15 }
 0x24a   :  { %1375 = vmatpush.msrb.mxu1 %v2295_v27  ;;  %1338 = vmatpush.msrb.mxu0 %v1165_v24 }
 0x24c   :  { %1377 = vmatpush.msrb.mxu1 %v2321_v18  ;;  %1342 = vmatpush.msrb.mxu0 %v1171_v33 }
 0x24e   :  { %1379 = vmatpush.msrb.mxu1 %v2333_v47  ;;  %1346 = vmatpush.msrb.mxu0 %v1177_v21  ;;  %v1420_v47 = vsub.f32 %v1400_v57, %v1419_v0 }
 0x250   :  { %1381 = vmatpush.msrb.mxu1 %v2351_v31  ;;  %1350 = vmatpush.msrb.mxu0 %v1183_v53  ;;  %v1421_v14 = vand.u32 4294901760, %v1420_v47 }
 0x252   :  { %1383 = vmatpush.msrb.mxu1 %v2364_v17  ;;  %1354 = vmatpush.msrb.mxu0 %v1189_v1  ;;  %v1422_v28 = vsub.f32 %v1420_v47, %v1421_v14 }
 0x254   :  { %1385 = vmatpush.msrb.mxu1 %v2376_v29  ;;  %v1423_v2 = vand.u32 4294901760, %v1422_v28 }
 0x256   :  { %1387 = vmatpush.msrb.mxu1 %v1082_v55 }
 0x258   :  { %1389 = vmatpush.msrb.mxu1 %v1084_v5 }
 0x25a   :  { %1391 = vmatpush.msrb.mxu1 %v1086_v41 }
 0x288   :  { %v915_v46 = vpop.f32.mrf.mxu0 }
 0x290   :  { %v941_v26 = vpop.f32.mrf.mxu1  ;;  %v965_v48 = vpop.f32.mrf.mxu0 }
 0x291   :  { %v942_v60 = vadd.f32 %v941_v26, %v915_v46 }
 0x293   :  { %v966_v38 = vadd.f32 %v965_v48, %v942_v60 }
 0x298   :  { %v989_v30 = vpop.f32.mrf.mxu1  ;;  %v1013_v9 = vpop.f32.mrf.mxu0 }
 0x299   :  { %v990_v3 = vadd.f32 %v989_v30, %v966_v38 }
 0x29b   :  { %v1014_v19 = vadd.f32 %v1013_v9, %v990_v3 }
 0x2a0   :  { %v1035_v25 = vpop.f32.mrf.mxu1 }
 0x2a1   :  { %v1036_v34 = vadd.f32 %v1035_v25, %v1014_v19 }
 0x2a3   :  { %v1038_v50 = vmul.f32 %v1036_v34, %v2208_v13 }
 0x2a5   :  { %v1088_v10 = vand.u32 4294901760, %v1038_v50 }
 0x2a7   :  { %v1089_v63 = vsub.f32 %v1038_v50, %v1088_v10  ;;  %1194 = vmatmul.f32.vlgmr.msra.gmra.mxu1 %v1088_v10 }
 0x2a9   :  { %1248 = vmatmul.f32.vlgmr.msra.gmra.mxu2 %v1089_v63  ;;  %v1090_v12 = vand.u32 4294901760, %v1089_v63 }
 0x2ab   :  { %1287 = vmatmul.f32.vlgmr.msra.gmra.mxu3 %v1090_v12  ;;  %v1091_v27 = vsub.f32 %v1089_v63, %v1090_v12 }
 0x2ad   :  { %v1092_v35 = vand.u32 4294901760, %v1091_v27 }
 0x2af   :  { %1093 = vmatmul.f32.vlgmr.msra.gmra.mxu0 %v1092_v35  ;;  %1393 = vmatmul.f32.vlgmr.msrb.gmra.mxu1 %v1088_v10 }
 0x2b7   :  { %1356 = vmatmul.f32.vlgmr.msrb.gmra.mxu0 %v1088_v10 }
 0x324   :  { %v1195_v18 = vpop.f32.mrf.mxu1 }
 0x32c   :  { %v1094_v42 = vpop.f32.mrf.mxu0  ;;  %v1249_v8 = vpop.f32.mrf.mxu2 }
 0x32d   :  { %v1196_v59 = vadd.f32 %v1195_v18, %v1094_v42  ;;  %v1394_v6 = vpop.f32.mrf.mxu1 }
 0x32e   :  { %v1288_v16 = vpop.f32.mrf.mxu3 }
 0x32f   :  { %v1250_v31 = vadd.f32 %v1249_v8, %v1196_v59 }
 0x331   :  { %v1289_v17 = vadd.f32 %v1288_v16, %v1250_v31 }
 0x334   :  { %v1357_v23 = vpop.f32.mrf.mxu0 }
 0x335   :  { %v1358_v29 = vadd.f32 %v1357_v23, %v1289_v17 }
 0x337   :  { %v1395_v36 = vadd.f32 %v1394_v6, %v1358_v29 }
 0x339   :  { %v1417_v7 = vand.u32 4294901760, %v1395_v36 }
 0x33b   :  { %v1444_v15 = vsub.f32 %v1395_v36, %v1417_v7  ;;  %1418 = vmatpush.msrb.mxu2 %v1417_v7 }
 0x33c   :  { %1424 = vmatmul.f32.vlgmr.msrb.gmra.mxu2 %v1423_v2 }
 0x33d   :  { %1471 = vmatpush.msra.mxu2 %v1444_v15  ;;  %v1445_v24 = vand.u32 4294901760, %v1444_v15 }
 0x33f   :  { %1520 = vmatpush.msrb.mxu2 %v1445_v24  ;;  %v1446_v33 = vsub.f32 %v1444_v15, %v1445_v24 }
 0x341   :  { %v1447_v45 = vand.u32 4294901760, %v1446_v33 }
 0x343   :  { %1448 = vmatpush.msrb.mxu3 %v1447_v45 }
 0x344   :  { %1450 = vmatmul.f32.vlgmr.msrb.gmra.mxu3 %v1419_v0  ;;  %1474 = vmatmul.f32.vlgmr.msra.gmra.mxu2 %v1420_v47 }
 0x345   :  { %1494 = vmatpush.msra.mxu3 %v1417_v7 }
 0x347   :  { %1542 = vmatpush.msrb.mxu3 %v1417_v7 }
 0x34c   :  { %1498 = vmatmul.f32.vlgmr.msra.gmra.mxu3 %v1421_v14  ;;  %1522 = vmatmul.f32.vlgmr.msrb.gmra.mxu2 %v1419_v0 }
 0x354   :  { %1544 = vmatmul.f32.vlgmr.msrb.gmra.mxu3 %v1419_v0 }
 0x3bf   :  { %v1425_v52 = vpop.f32.mrf.mxu2 }
 0x3c7   :  { %v1451_v58 = vpop.f32.mrf.mxu3  ;;  %v1475_v32 = vpop.f32.mrf.mxu2 }
 0x3c8   :  { %v1452_v37 = vadd.f32 %v1451_v58, %v1425_v52 }
 0x3ca   :  { %v1476_v49 = vadd.f32 %v1475_v32, %v1452_v37 }
 0x3cf   :  { %v1499_v43 = vpop.f32.mrf.mxu3  ;;  %v1523_v61 = vpop.f32.mrf.mxu2 }
 0x3d0   :  { %v1500_v55 = vadd.f32 %v1499_v43, %v1476_v49 }
 0x3d2   :  { %v1524_v4 = vadd.f32 %v1523_v61, %v1500_v55 }
 0x3d7   :  { %v1545_v5 = vpop.f32.mrf.mxu3 }
 0x3d8   :  { %v1546_v44 = vadd.f32 %v1545_v5, %v1524_v4 }
 0x3da   :  { %v1548_v21 = vmul.f32 %v1546_v44, %v2208_v13 }
 0x3dc   :  { %v1549_v22 = vmul.f32 %v1548_v21, %v1548_v21 }
 0x3de   :  { %1550 = vst [vmem:[#allocation2] sm:$0xff] %v1549_v22 }
 0x3df   :  { %1561 = dma.vmem_to_hbm [thread:$0]  %s1557_s11, 128, %s1559_s14, [#allocation3]  }
 0x3e0   :  { %1626 = dma.done.wait [#allocation3], 128  }
 0x3e1   :  { %1627 = vsyncadd [#allocation3], 4294967168 }
 0x3e2   :  { %1566 = vsyncpa [#allocation3], 1 }

</bundles_post_ra>
